<compile_context>
chip_gen: v6e
topology: v6e:2x2x1
jax: 0.10.0
libtpu: 0.0.40
codegen_flags: <defaults>
</compile_context>

<pallas_src>
import numpy as np
import jax
import jax.numpy as jnp
from jax import lax
from jax.experimental import pallas as pl
from jax.experimental.pallas import tpu as pltpu

EPS = 1e-5


# --------------------------------------------------------------------------- #
# Kernels
# --------------------------------------------------------------------------- #
def _linear_kernel(z_ref, w_ref, b_ref, o_ref):
    o_ref[...] = (jnp.dot(z_ref[...], w_ref[...],
                          preferred_element_type=jnp.float32)
                  + b_ref[...]).astype(o_ref.dtype)


def _up2(a):
    """Nearest 2x spatial upsample (R, C, K) -> (2R, 2C, K) on the VPU."""
    r, c, k = a.shape
    a = jnp.broadcast_to(a[:, :, None, :], (r, c, 2, k)).reshape(r, 2 * c, k)
    a = jnp.broadcast_to(a[:, None, :, :], (r, 2, 2 * c, k)).reshape(2 * r, 2 * c, k)
    return a


def _genblock_kernel(xp_ref, s1_ref, t1_ref, w1_ref, s2_ref, t2_ref,
                     w2_ref, ws_ref, bo_ref, out_ref):
    # xp_ref : (H+2, W+2, Cin)    zero-padded input image (batch dim squeezed)
    # s1/t1  : (1, 1, Cin)        BN1 folded to scale / shift
    # w1     : (3, 3, Cin, Cout)  conv1 weights (HWIO), applied on upsampled act.
    # s2/t2  : (1, 1, Cout)       BN2 folded (conv1 bias folded into t2)
    # w2     : (3, 3, Cout, Cout) conv2 weights
    # ws     : (Cin, Cout)        shortcut 1x1 conv
    # bo     : (1, 1, Cout)       b2 + bs
    # out_ref: (Tu, 2W*Cout)      lane-dense output row tile (upsampled rows)
    Hp, Wp, Cin = xp_ref.shape
    H, W = Hp - 2, Wp - 2
    Cout = w1_ref.shape[3]
    Wu = 2 * W
    Tu = out_ref.shape[0]                  # output rows per tile (upsampled space)
    Ti = Tu // 2 + 2                       # input rows needed incl. 1-row halo

    tile = pl.program_id(1)
    row_start = tile * (Tu // 2)           # first padded-input row of this tile
    r0 = tile * Tu                         # first upsampled output row

    xpt = xp_ref[pl.ds(row_start, Ti)]     # (Ti, W+2, Cin)

    # --- BN1 + ReLU; zero the image-border halo (Conv2d pads AFTER bn/relu/up,
    #     so pad pixels must be exactly 0, not relu(t1)) -----------------------
    h = jnp.maximum(xpt * s1_ref[...] + t1_ref[...], 0.0)
    rid = lax.broadcasted_iota(jnp.int32, (Ti, 1, 1), 0) + row_start
    cid = lax.broadcasted_iota(jnp.int32, (1, Wp, 1), 1)
    mask1 = ((rid >= 1) & (rid <= H) & (cid >= 1) & (cid <= W)).astype(jnp.float32)
    h = h * mask1

    # --- nearest 2x upsample (no matmul) --------------------------------------
    hu = _up2(h)                           # (Tu+4, Wu+4, Cin): ups. rows r0-2..r0+Tu+1

    # --- conv1 (3x3) on an extended (+1 row/col) grid so conv2 gets its halo --
    Me = (Tu + 2) * (Wu + 2)
    acc1 = jnp.zeros((Me, Cout), jnp.float32)
    for dy in range(3):
        for dx in range(3):
            patch = hu[dy:dy + Tu + 2, dx:dx + Wu + 2, :].reshape(Me, Cin)
            acc1 = acc1 + jnp.dot(patch, w1_ref[dy, dx],
                                  preferred_element_type=jnp.float32)
    c1 = acc1.reshape(Tu + 2, Wu + 2, Cout)

    # --- BN2 + ReLU; zero rows/cols that are conv2's zero padding -------------
    h2 = jnp.maximum(c1 * s2_ref[...] + t2_ref[...], 0.0)
    rid2 = lax.broadcasted_iota(jnp.int32, (Tu + 2, 1, 1), 0) + r0
    cid2 = lax.broadcasted_iota(jnp.int32, (1, Wu + 2, 1), 1)
    mask2 = ((rid2 >= 1) & (rid2 <= 2 * H) &
             (cid2 >= 1) & (cid2 <= Wu)).astype(jnp.float32)
    h2 = h2 * mask2

    # --- conv2 (3x3): residual branch ------------------------------------------
    M = Tu * Wu
    acc2 = jnp.zeros((M, Cout), jnp.float32)
    for dy in range(3):
        for dx in range(3):
            patch = h2[dy:dy + Tu, dx:dx + Wu, :].reshape(M, Cout)
            acc2 = acc2 + jnp.dot(patch, w2_ref[dy, dx],
                                  preferred_element_type=jnp.float32)
    res = acc2.reshape(Tu, Wu, Cout)

    # --- shortcut: 1x1 conv commutes with nearest upsample -> conv at low res -
    xc = xpt[1:1 + Tu // 2, 1:1 + W, :].reshape((Tu // 2) * W, Cin)
    sc = jnp.dot(xc, ws_ref[...], preferred_element_type=jnp.float32)
    sc = _up2(sc.reshape(Tu // 2, W, Cout))            # (Tu, Wu, Cout)

    out = res + sc + bo_ref[...]
    # lane-dense store: (Tu, Wu*Cout), minor dim is a big multiple of 128
    out_ref[...] = out.reshape(Tu, Wu * Cout).astype(out_ref.dtype)


def _head_kernel(xp_ref, s_ref, t_ref, w_ref, b_ref, out_ref):
    # BN -> ReLU -> Conv3x3(C -> 3) -> Tanh, lane-dense (Th, W*3) output tile.
    Hp, Wp, C = xp_ref.shape
    H, W = Hp - 2, Wp - 2
    Co = w_ref.shape[3]
    Th = out_ref.shape[0]

    tile = pl.program_id(1)
    row_start = tile * Th
    xpt = xp_ref[pl.ds(row_start, Th + 2)]             # (Th+2, W+2, C)

    h = jnp.maximum(xpt * s_ref[...] + t_ref[...], 0.0)
    rid = lax.broadcasted_iota(jnp.int32, (Th + 2, 1, 1), 0) + row_start
    cid = lax.broadcasted_iota(jnp.int32, (1, Wp, 1), 1)
    mask = ((rid >= 1) & (rid <= H) & (cid >= 1) & (cid <= W)).astype(jnp.float32)
    h = h * mask

    M = Th * W
    acc = jnp.zeros((M, Co), jnp.float32)
    for dy in range(3):
        for dx in range(3):
            patch = h[dy:dy + Th, dx:dx + W, :].reshape(M, C)
            acc = acc + jnp.dot(patch, w_ref[dy, dx],
                                preferred_element_type=jnp.float32)
    img = jnp.tanh(acc + b_ref[...])
    out_ref[...] = img.reshape(Th, W * Co).astype(out_ref.dtype)


# --------------------------------------------------------------------------- #
# pallas_call wrappers
# --------------------------------------------------------------------------- #
def _linear_call(z, wl, bl):
    N, D = z.shape[0], wl.shape[1]
    return pl.pallas_call(
        _linear_kernel,
        out_shape=jax.ShapeDtypeStruct((N, D), jnp.float32),
    )(z, wl, bl)


def _genblock_call(x_nhwc, fp, tile_rows=64):
    N, H, W, Cin = x_nhwc.shape
    Cout = fp['w1'].shape[3]
    Hu, Wu = 2 * H, 2 * W
    Tu = min(tile_rows, Hu)
    assert Hu % Tu == 0 and Tu % 2 == 0 and (Tu == Hu or Tu % 8 == 0)
    T = Hu // Tu

    xp = jnp.pad(x_nhwc, ((0, 0), (1, 1), (1, 1), (0, 0)))   # 1-pixel zero halo

    out = pl.pallas_call(
        _genblock_kernel,
        out_shape=jax.ShapeDtypeStruct((N, Hu, Wu * Cout), jnp.float32),
        grid=(N, T),
        in_specs=[
            pl.BlockSpec((None, H + 2, W + 2, Cin), lambda n, t: (n, 0, 0, 0)),
            pl.BlockSpec((1, 1, Cin),        lambda n, t: (0, 0, 0)),
            pl.BlockSpec((1, 1, Cin),        lambda n, t: (0, 0, 0)),
            pl.BlockSpec((3, 3, Cin, Cout),  lambda n, t: (0, 0, 0, 0)),
            pl.BlockSpec((1, 1, Cout),       lambda n, t: (0, 0, 0)),
            pl.BlockSpec((1, 1, Cout),       lambda n, t: (0, 0, 0)),
            pl.BlockSpec((3, 3, Cout, Cout), lambda n, t: (0, 0, 0, 0)),
            pl.BlockSpec((Cin, Cout),        lambda n, t: (0, 0)),
            pl.BlockSpec((1, 1, Cout),       lambda n, t: (0, 0, 0)),
        ],
        out_specs=pl.BlockSpec((None, Tu, Wu * Cout), lambda n, t: (n, t, 0)),
        compiler_params=pltpu.CompilerParams(
            dimension_semantics=("parallel", "parallel"),
            vmem_limit_bytes=48 * 1024 * 1024),
    )(xp, fp['s1'], fp['t1'], fp['w1'], fp['s2'], fp['t2'],
      fp['w2'], fp['ws'], fp['bo'])
    return out.reshape(N, Hu, Wu, Cout)


def _head_call(x_nhwc, fp, tile_rows=64):
    N, H, W, C = x_nhwc.shape
    Co = fp['w'].shape[3]
    Th = min(tile_rows, H)
    assert H % Th == 0 and (Th == H or Th % 8 == 0)
    T = H // Th
    xp = jnp.pad(x_nhwc, ((0, 0), (1, 1), (1, 1), (0, 0)))

    out = pl.pallas_call(
        _head_kernel,
        out_shape=jax.ShapeDtypeStruct((N, H, W * Co), jnp.float32),
        grid=(N, T),
        in_specs=[
            pl.BlockSpec((None, H + 2, W + 2, C), lambda n, t: (n, 0, 0, 0)),
            pl.BlockSpec((1, 1, C),    lambda n, t: (0, 0, 0)),
            pl.BlockSpec((1, 1, C),    lambda n, t: (0, 0, 0)),
            pl.BlockSpec((3, 3, C, Co), lambda n, t: (0, 0, 0, 0)),
            pl.BlockSpec((1, Co),      lambda n, t: (0, 0)),
        ],
        out_specs=pl.BlockSpec((None, Th, W * Co), lambda n, t: (n, t, 0)),
        compiler_params=pltpu.CompilerParams(
            dimension_semantics=("parallel", "parallel"),
            vmem_limit_bytes=48 * 1024 * 1024),
    )(xp, fp['s'], fp['t'], fp['w'], fp['b'])
    return out.reshape(N, H, W, Co)


def generator_forward(z, folded, tile_rows=64):
    """Full ResGenerator256 forward: z (N, latent) -> image (N, 3, 2^6*4, 2^6*4)."""
    N = z.shape[0]
    c0 = folded['c0']
    x = _linear_call(z, folded['wl'], folded['bl'])
    x = x.reshape(N, c0, 4, 4).transpose(0, 2, 3, 1)     # PyTorch NCHW view -> NHWC
    for bp in folded['blocks']:
        x = _genblock_call(x, bp, tile_rows)
    img = _head_call(x, folded['head'], tile_rows)
    return img.transpose(0, 3, 1, 2)                      # NCHW like the nn.Module


# --------------------------------------------------------------------------- #
# Parameters (kaiming conv weights, inference-mode BatchNorm) + folding
# --------------------------------------------------------------------------- #
# TODO(synk): training-mode BatchNorm (per-batch statistics) is not computed
#             in-kernel; BN is folded to inference-mode per-channel scale/shift.
def init_raw_params(key, latent_dim, channels):
    keys = jax.random.split(key, 2 + len(channels))
    c0 = channels[0]
    wl = jnp.sqrt(2.0 / latent_dim) * jax.random.normal(
        keys[0], (latent_dim, 16 * c0), jnp.float32)
    bl = jnp.zeros((16 * c0,), jnp.float32)
    blocks = []
    for i in range(len(channels) - 1):
        cin, cout = channels[i], channels[i + 1]
        k = jax.random.split(keys[1 + i], 16)
        blocks.append(dict(
            g1=1.0 + 0.1 * jax.random.normal(k[0], (cin,), jnp.float32),
            be1=0.1 * jax.random.normal(k[1], (cin,), jnp.float32),
            m1=0.1 * jax.random.normal(k[2], (cin,), jnp.float32),
            v1=1.0 + 0.2 * jax.random.uniform(k[3], (cin,), jnp.float32),
            w1=jnp.sqrt(2.0 / (9 * cin)) * jax.random.normal(
                k[4], (3, 3, cin, cout), jnp.float32),
            b1=0.05 * jax.random.normal(k[5], (cout,), jnp.float32),
            g2=1.0 + 0.1 * jax.random.normal(k[6], (cout,), jnp.float32),
            be2=0.1 * jax.random.normal(k[7], (cout,), jnp.float32),
            m2=0.1 * jax.random.normal(k[8], (cout,), jnp.float32),
            v2=1.0 + 0.2 * jax.random.uniform(k[9], (cout,), jnp.float32),
            w2=jnp.sqrt(2.0 / (9 * cout)) * jax.random.normal(
                k[10], (3, 3, cout, cout), jnp.float32),
            b2=0.05 * jax.random.normal(k[11], (cout,), jnp.float32),
            ws=jnp.sqrt(2.0 / cin) * jax.random.normal(
                k[12], (cin, cout), jnp.float32),
            bs=0.05 * jax.random.normal(k[13], (cout,), jnp.float32),
        ))
    ch = channels[-1]
    kh = jax.random.split(keys[-1], 8)
    head = dict(
        g=1.0 + 0.1 * jax.random.normal(kh[0], (ch,), jnp.float32),
        be=0.1 * jax.random.normal(kh[1], (ch,), jnp.float32),
        m=0.1 * jax.random.normal(kh[2], (ch,), jnp.float32),
        v=1.0 + 0.2 * jax.random.uniform(kh[3], (ch,), jnp.float32),
        w=jnp.sqrt(2.0 / (9 * ch)) * jax.random.normal(
            kh[4], (3, 3, ch, 3), jnp.float32),
        b=0.05 * jax.random.normal(kh[5], (3,), jnp.float32),
    )
    return dict(c0=c0, wl=wl, bl=bl, blocks=blocks, head=head)


def fold_params(raw):
    def fold_bn(g, be, m, v):
        s = g / jnp.sqrt(v + EPS)
        return s, be - m * s

    blocks = []
    for p in raw['blocks']:
        cin, cout = p['w1'].shape[2], p['w1'].shape[3]
        s1, t1 = fold_bn(p['g1'], p['be1'], p['m1'], p['v1'])
        s2, t2 = fold_bn(p['g2'], p['be2'], p['m2'], p['v2'])
        t2 = t2 + p['b1'] * s2                     # fold conv1 bias through BN2
        blocks.append(dict(
            s1=s1.reshape(1, 1, cin), t1=t1.reshape(1, 1, cin), w1=p['w1'],
            s2=s2.reshape(1, 1, cout), t2=t2.reshape(1, 1, cout), w2=p['w2'],
            ws=p['ws'], bo=(p['b2'] + p['bs']).reshape(1, 1, cout)))
    hp = raw['head']
    ch = hp['w'].shape[2]
    s, t = fold_bn(hp['g'], hp['be'], hp['m'], hp['v'])
    head = dict(s=s.reshape(1, 1, ch), t=t.reshape(1, 1, ch),
                w=hp['w'], b=hp['b'].reshape(1, 3))
    return dict(c0=raw['c0'], wl=raw['wl'], bl=raw['bl'].reshape(1, -1),
                blocks=blocks, head=head)


# --------------------------------------------------------------------------- #
# Pure-JAX reference (for the correctness check)
# --------------------------------------------------------------------------- #
def ref_forward(z, raw):
    HI = lax.Precision.HIGHEST

    def bnorm(x, g, b, m, v):
        return (x - m) * (g / jnp.sqrt(v + EPS)) + b

    def conv3(x, w):
        return lax.conv_general_dilated(
            x, w, (1, 1), 'SAME',
            dimension_numbers=('NHWC', 'HWIO', 'NHWC'), precision=HI)

    def up2(x):
        return jnp.repeat(jnp.repeat(x, 2, axis=1), 2, axis=2)

    N = z.shape[0]
    x = jnp.dot(z, raw['wl'], precision=HI) + raw['bl']
    x = x.reshape(N, raw['c0'], 4, 4).transpose(0, 2, 3, 1)
    for p in raw['blocks']:
        h = jnp.maximum(bnorm(x, p['g1'], p['be1'], p['m1'], p['v1']), 0.0)
        c1 = conv3(up2(h), p['w1']) + p['b1']
        h2 = jnp.maximum(bnorm(c1, p['g2'], p['be2'], p['m2'], p['v2']), 0.0)
        c2 = conv3(h2, p['w2']) + p['b2']
        sc = jnp.einsum('nhwi,io->nhwo', up2(x), p['ws'], precision=HI) + p['bs']
        x = c2 + sc
    hp = raw['head']
    h = jnp.maximum(bnorm(x, hp['g'], hp['be'], hp['m'], hp['v']), 0.0)
    img = jnp.tanh(conv3(h, hp['w']) + hp['b'])
    return img.transpose(0, 3, 1, 2)


# --------------------------------------------------------------------------- #
if __name__ == "__main__":
    key = jax.random.PRNGKey(0)
    kz, kp = jax.random.split(key)

    # ResGenerator256 structure (Linear -> 6 GenBlocks, 4x4 -> 256x256 -> head).
    # The real model uses latent=128 and channels [1024,1024,512,512,256,128,64];
    # the demo keeps the full structure with 8x narrower channels so it stays small.
    latent_dim = 64
    channels = [128, 128, 64, 64, 32, 16, 8]
    batch = 2

    z = jax.random.normal(kz, (batch, latent_dim), jnp.float32)
    raw = init_raw_params(kp, latent_dim, channels)
    folded = fold_params(raw)

    out = generator_forward(z, folded, tile_rows=64)
    jax.block_until_ready(out)
    assert out.shape == (batch, 3, 256, 256), out.shape

    ref = ref_forward(z, raw)
    np.testing.assert_allclose(np.asarray(out), np.asarray(ref),
                               atol=2e-3, rtol=2e-3)

    print("KERNEL_OK")
</pallas_src>

<mosaic_0001>
module attributes {stable_mosaic.version = 11 : i64} {
  func.func @_linear_kernel(%arg0: memref<2x64xf32, #tpu.memory_space<vmem>>, %arg1: memref<64x2048xf32, #tpu.memory_space<vmem>>, %arg2: memref<1x2048xf32, #tpu.memory_space<vmem>>, %arg3: memref<2x2048xf32, #tpu.memory_space<vmem>>) attributes {dimension_semantics = [], scalar_prefetch = 0 : i64, scratch_operands = 0 : i64, tpu.core_type = #tpu.core_type<tc>} {
    %c0 = arith.constant 0 : index
    %c0_0 = arith.constant 0 : index
    %0 = vector.load %arg0[%c0, %c0_0] : memref<2x64xf32, #tpu.memory_space<vmem>>, vector<2x64xf32>
    %c0_1 = arith.constant 0 : index
    %c0_2 = arith.constant 0 : index
    %1 = vector.load %arg1[%c0_1, %c0_2] : memref<64x2048xf32, #tpu.memory_space<vmem>>, vector<64x2048xf32>
    %cst = arith.constant dense<0.000000e+00> : vector<2x2048xf32>
    %2 = tpu.matmul %0, %1, %cst {dimension_numbers = #tpu.dot_dimension_numbers<[1], [0], [0], [1], [0, 0, 1, 1], [], []>} : vector<2x64xf32>, vector<64x2048xf32>, vector<2x2048xf32> -> vector<2x2048xf32>
    %c0_3 = arith.constant 0 : index
    %c0_4 = arith.constant 0 : index
    %3 = vector.load %arg2[%c0_3, %c0_4] : memref<1x2048xf32, #tpu.memory_space<vmem>>, vector<1x2048xf32>
    %4 = vector.broadcast %3 : vector<1x2048xf32> to vector<2x2048xf32>
    %5 = arith.addf %2, %4 : vector<2x2048xf32>
    %c0_5 = arith.constant 0 : index
    %c0_6 = arith.constant 0 : index
    %6 = vector.load %arg3[%c0_5, %c0_6] : memref<2x2048xf32, #tpu.memory_space<vmem>>, vector<2x2048xf32>
    tpu.vector_store %arg3[%c0_5, %c0_6], %5 {strides = array<i32>} : memref<2x2048xf32, #tpu.memory_space<vmem>>, vector<2x2048xf32>,
    return
  }
}

</mosaic_0001>

<bundles_post_ra>
// kernel: tpu_custom_call.1
= control target key start
LH: loop header
LB: loop body
LE: loop exit
PB: predicated region body
PF: predicated region fallthrough
CT: control target
= control target key end

     0   :  { %8 = vsyncpa [#allocation3], 0  ;;  %s1134_s0 = inlined_call_operand.hbm [shape: f32[2,64], index: 0, kind: input, shape index: {}]   ;;  %s1135_s1 = inlined_call_operand.hbm [shape: f32[64,2048], index: 1, kind: input, shape index: {}]   ;;  %s1136_s2 = inlined_call_operand.hbm [shape: f32[1,2048], index: 2, kind: input, shape index: {}]   ;;  %s1137_s3 = inlined_call_operand.hbm [shape: f32[2,2048], index: 3, kind: output, shape index: {}]  }
   0x1   :  { %9 = vsyncpa [#allocation6], 0 }
   0x2   :  { %10 = vsyncpa [#allocation4], 0  ;;  %s1047_s12 = smov [#allocation5]  }
   0x3   :  { %s26_s13 = sshll.u32 %s1047_s12, 4  ;;  %s27_s13 = int_to_ptr.vmem [resolvable:$true] %s26_s13 }
   0x4   :  { %s969_s14 = scalar_lea.vmem %s27_s13, 16384  ;;  %p974_p1 = scmp.lt.s32.totalorder %s27_s13, %s27_s13 }
   0x5   :  { %p970_p0 = scmp.ne.s32.totalorder %s27_s13, %s969_s14  ;;  %p975_p2 = scmp.lt.s32.totalorder %s969_s14, %s969_s14 }
   0x7   :  { %p976_p3 = por %p975_p2, %p974_p1 }
   0x9   :  { %p977_p4 = pnand %p976_p3, %p970_p0 }
   0xb   :  { %980 = shalt.err (!%p977_p4)
}
   0xc   :  { %s1048_s15 = smov 2048   ;;  %s1049_s16 = smov 128  }
   0xd   :  { %32 = dma.hbm_to_vmem [thread:$0]  %s1135_s1, 16384, %s27_s13, [#allocation6], %s1048_s15, %s1048_s15, %s1049_s16  }
   0xe   :  { %s1050_s19 = smov [#allocation2]   ;;  %s1051_s21 = smov [#allocation7]  }
   0xf   :  { %s17_s20 = sshll.u32 %s1050_s19, 4  ;;  %s39_s22 = sshll.u32 %s1051_s21, 4  ;;  %s18_s20 = int_to_ptr.vmem [resolvable:$true] %s17_s20  ;;  %s40_s22 = int_to_ptr.vmem [resolvable:$true] %s39_s22 }
  0x10   :  { %s989_s23 = scalar_lea.vmem %s18_s20, 32  ;;  %p994_p6 = scmp.lt.s32.totalorder %s18_s20, %s18_s20 }
  0x11   :  { %p990_p5 = scmp.ne.s32.totalorder %s18_s20, %s989_s23  ;;  %p995_p7 = scmp.lt.s32.totalorder %s989_s23, %s989_s23 }
  0x13   :  { %p996_p8 = por %p995_p7, %p994_p6 }
  0x15   :  { %p997_p9 = pnand %p996_p8, %p990_p5 }
  0x17   :  { %1000 = shalt.err (!%p997_p9)
}
  0x18   :  { %20 = dma.hbm_to_vmem [thread:$0]  %s1134_s0, 32, %s18_s20, [#allocation3]  }
  0x19   :  { %s1009_s26 = scalar_lea.vmem %s40_s22, 256  ;;  %p1014_p11 = scmp.lt.s32.totalorder %s40_s22, %s40_s22 }
  0x1a   :  { %p1010_p10 = scmp.ne.s32.totalorder %s40_s22, %s1009_s26  ;;  %p1015_p12 = scmp.lt.s32.totalorder %s1009_s26, %s1009_s26 }
  0x1c   :  { %p1016_p13 = por %p1015_p12, %p1014_p11 }
  0x1e   :  { %p1017_p0 = pnand %p1016_p13, %p1010_p10 }
  0x20   :  { %1020 = shalt.err (!%p1017_p0)
}
  0x21   :  { %42 = dma.hbm_to_vmem [thread:$0]  %s1136_s2, 256, %s40_s22, [#allocation6]  }
  0x22   :  { %1041 = dma.done.wait [#allocation3], 32  }
  0x23   :  { %1042 = vsyncadd [#allocation3], 4294967264 }
  0x24   :  { %1043 = dma.done.wait [#allocation6], 16640  }
  0x25   :  { %1044 = vsyncadd [#allocation6], 4294950656  ;;  %v1052_v0 = vmov 0.0   ;;  %v166_v1 = vld [vmem:[#allocation5 + $0x388] sm:$0xff]  ;;  %v168_v2 = vld [vmem:[#allocation5 + $0x398] sm:$0xff]  ;;  %vm265_vm0 = vcmask 523264  }
  0x26   :  { %333 = vmatprep.mubr.f32.mxu0 %v1052_v0  ;;  %404 = vmatprep.mubr.f32.mxu1 %v1052_v0  ;;  %v165_v3 = vld [vmem:[#allocation5 + $0x380] sm:$0xff]  ;;  %v167_v4 = vld [vmem:[#allocation5 + $0x390] sm:$0xff]  ;;  %v150_v5 = vld [vmem:[#allocation5 + $0x308] sm:$0xff]  ;;  %s1054_s0 = smov [#allocation8]  }
  0x27   :  { %285 = vmatprep.subr.mxu0 %v166_v1  ;;  %356 = vmatprep.subr.mxu1 %v168_v2  ;;  %v152_v6 = vld [vmem:[#allocation5 + $0x318] sm:$0xff]  ;;  %v149_v7 = vld [vmem:[#allocation5 + $0x300] sm:$0xff]  ;;  %v151_v8 = vld [vmem:[#allocation5 + $0x310] sm:$0xff]  ;;  %s935_s2 = sshll.u32 %s1054_s0, 4  ;;  %s936_s2 = int_to_ptr.vmem [resolvable:$true] %s935_s2 }
  0x28   :  { %286 = vmatpush1.msra.mxu0 %v165_v3  ;;  %357 = vmatpush1.msra.mxu1 %v167_v4  ;;  %v134_v9 = vld [vmem:[#allocation5 + $0x288] sm:$0xff]  ;;  %v136_v10 = vld [vmem:[#allocation5 + $0x298] sm:$0xff]  ;;  %v133_v11 = vld [vmem:[#allocation5 + $0x280] sm:$0xff]  ;;  %s1021_s28 = scalar_lea.vmem %s936_s2, 512  ;;  %p1026_p2 = scmp.lt.s32.totalorder %s936_s2, %s936_s2 }
  0x29   :  { %287 = vmatprep.subr.mxu0 %v150_v5  ;;  %358 = vmatprep.subr.mxu1 %v152_v6  ;;  %v135_v12 = vld [vmem:[#allocation5 + $0x290] sm:$0xff]  ;;  %v118_v13 = vld [vmem:[#allocation5 + $0x208] sm:$0xff]  ;;  %v120_v14 = vld [vmem:[#allocation5 + $0x218] sm:$0xff]  ;;  %p1022_p1 = scmp.ne.s32.totalorder %s936_s2, %s1021_s28  ;;  %p1027_p3 = scmp.lt.s32.totalorder %s1021_s28, %s1021_s28 }
  0x2a   :  { %288 = vmatpush1.msra.mxu0 %v149_v7  ;;  %359 = vmatpush1.msra.mxu1 %v151_v8  ;;  %v117_v15 = vld [vmem:[#allocation5 + $0x200] sm:$0xff]  ;;  %v119_v16 = vld [vmem:[#allocation5 + $0x210] sm:$0xff]  ;;  %v102_v17 = vld [vmem:[#allocation5 + $0x188] sm:$0xff] }
  0x2b   :  { %289 = vmatprep.subr.mxu0 %v134_v9  ;;  %360 = vmatprep.subr.mxu1 %v136_v10  ;;  %v104_v18 = vld [vmem:[#allocation5 + $0x198] sm:$0xff]  ;;  %v101_v19 = vld [vmem:[#allocation5 + $0x180] sm:$0xff]  ;;  %v103_v20 = vld [vmem:[#allocation5 + $0x190] sm:$0xff]  ;;  %p1028_p4 = por %p1027_p3, %p1026_p2 }
  0x2c   :  { %290 = vmatpush1.msra.mxu0 %v133_v11  ;;  %361 = vmatpush1.msra.mxu1 %v135_v12  ;;  %v86_v21 = vld [vmem:[#allocation5 + $0x108] sm:$0xff]  ;;  %v88_v22 = vld [vmem:[#allocation5 + $0x118] sm:$0xff]  ;;  %v85_v23 = vld [vmem:[#allocation5 + $0x100] sm:$0xff] }
  0x2d   :  { %291 = vmatprep.subr.mxu0 %v118_v13  ;;  %362 = vmatprep.subr.mxu1 %v120_v14  ;;  %v87_v24 = vld [vmem:[#allocation5 + $0x110] sm:$0xff]  ;;  %v70_v25 = vld [vmem:[#allocation5 + $0x88] sm:$0xff]  ;;  %v72_v26 = vld [vmem:[#allocation5 + $0x98] sm:$0xff]  ;;  %p1029_p5 = pnand %p1028_p4, %p1022_p1 }
  0x2e   :  { %292 = vmatpush1.msra.mxu0 %v117_v15  ;;  %363 = vmatpush1.msra.mxu1 %v119_v16  ;;  %v69_v27 = vld [vmem:[#allocation5 + $0x80] sm:$0xff]  ;;  %v71_v28 = vld [vmem:[#allocation5 + $0x90] sm:$0xff]  ;;  %v54_v29 = vld [vmem:[#allocation5 + $0x8] sm:$0xff] }
  0x2f   :  { %293 = vmatprep.subr.mxu0 %v102_v17  ;;  %364 = vmatprep.subr.mxu1 %v104_v18  ;;  %v56_v30 = vld [vmem:[#allocation5 + $0x18] sm:$0xff]  ;;  %v53_v31 = vld [vmem:[#allocation5] sm:$0xff]  ;;  %v55_v32 = vld [vmem:[#allocation5 + $0x10] sm:$0xff] }
  0x30   :  { %294 = vmatpush1.msra.mxu0 %v101_v19  ;;  %365 = vmatpush1.msra.mxu1 %v103_v20  ;;  %v1086_v33 = vld [vmem:[#allocation2] sm:$0x3]  ;;  %v170_v34 = vld [vmem:[#allocation5 + $0x3a8] sm:$0xff]  ;;  %v169_v36 = vld [vmem:[#allocation5 + $0x3a0] sm:$0xff] }
  0x31   :  { %295 = vmatprep.subr.mxu0 %v86_v21  ;;  %366 = vmatprep.subr.mxu1 %v88_v22  ;;  %v172_v35 = vld [vmem:[#allocation5 + $0x3b8] sm:$0xff]  ;;  %v171_v37 = vld [vmem:[#allocation5 + $0x3b0] sm:$0xff]  ;;  %v154_v38 = vld [vmem:[#allocation5 + $0x328] sm:$0xff] }
  0x32   :  { %296 = vmatpush1.msra.mxu0 %v85_v23  ;;  %367 = vmatpush1.msra.mxu1 %v87_v24  ;;  %v156_v39 = vld [vmem:[#allocation5 + $0x338] sm:$0xff]  ;;  %v153_v40 = vld [vmem:[#allocation5 + $0x320] sm:$0xff]  ;;  %v155_v41 = vld [vmem:[#allocation5 + $0x330] sm:$0xff] }
  0x33   :  { %297 = vmatprep.subr.mxu0 %v70_v25  ;;  %368 = vmatprep.subr.mxu1 %v72_v26  ;;  %v138_v42 = vld [vmem:[#allocation5 + $0x2a8] sm:$0xff]  ;;  %v140_v43 = vld [vmem:[#allocation5 + $0x2b8] sm:$0xff]  ;;  %v137_v44 = vld [vmem:[#allocation5 + $0x2a0] sm:$0xff] }
  0x34   :  { %298 = vmatpush1.msra.mxu0 %v69_v27  ;;  %369 = vmatpush1.msra.mxu1 %v71_v28  ;;  %v139_v45 = vld [vmem:[#allocation5 + $0x2b0] sm:$0xff]  ;;  %v122_v46 = vld [vmem:[#allocation5 + $0x228] sm:$0xff]  ;;  %v124_v47 = vld [vmem:[#allocation5 + $0x238] sm:$0xff] }
  0x35   :  { %299 = vmatprep.subr.mxu0 %v54_v29  ;;  %370 = vmatprep.subr.mxu1 %v56_v30  ;;  %v121_v48 = vld [vmem:[#allocation5 + $0x220] sm:$0xff]  ;;  %v123_v49 = vld [vmem:[#allocation5 + $0x230] sm:$0xff]  ;;  %v106_v50 = vld [vmem:[#allocation5 + $0x1a8] sm:$0xff] }
  0x36   :  { %300 = vmatpush1.msra.mxu0 %v53_v31  ;;  %371 = vmatpush1.msra.mxu1 %v55_v32  ;;  %v108_v51 = vld [vmem:[#allocation5 + $0x1b8] sm:$0xff]  ;;  %v105_v52 = vld [vmem:[#allocation5 + $0x1a0] sm:$0xff]  ;;  %v107_v53 = vld [vmem:[#allocation5 + $0x1b0] sm:$0xff] }
  0x37   :  { %945 = vmatmul.mubr.msk.f32.vlgmr.msra.gmra.mxu0 %vm265_vm0, %v1086_v33  ;;  %946 = vmatmul.mubr.msk.f32.vlgmr.msra.gmra.mxu1 %vm265_vm0, %v1086_v33  ;;  %v90_v54 = vld [vmem:[#allocation5 + $0x128] sm:$0xff]  ;;  %v92_v55 = vld [vmem:[#allocation5 + $0x138] sm:$0xff]  ;;  %v89_v56 = vld [vmem:[#allocation5 + $0x120] sm:$0xff] }
  0x38   :  { %427 = vmatprep.subr.mxu0 %v170_v34  ;;  %498 = vmatprep.subr.mxu1 %v172_v35  ;;  %v91_v57 = vld [vmem:[#allocation5 + $0x130] sm:$0xff]  ;;  %v74_v58 = vld [vmem:[#allocation5 + $0xa8] sm:$0xff]  ;;  %v76_v59 = vld [vmem:[#allocation5 + $0xb8] sm:$0xff] }
  0x39   :  { %428 = vmatpush1.msra.mxu0 %v169_v36  ;;  %499 = vmatpush1.msra.mxu1 %v171_v37  ;;  %v73_v60 = vld [vmem:[#allocation5 + $0xa0] sm:$0xff]  ;;  %v75_v61 = vld [vmem:[#allocation5 + $0xb0] sm:$0xff]  ;;  %v58_v62 = vld [vmem:[#allocation5 + $0x28] sm:$0xff] }
  0x3a   :  { %429 = vmatprep.subr.mxu0 %v154_v38  ;;  %500 = vmatprep.subr.mxu1 %v156_v39  ;;  %v60_v63 = vld [vmem:[#allocation5 + $0x38] sm:$0xff]  ;;  %v57_v1 = vld [vmem:[#allocation5 + $0x20] sm:$0xff]  ;;  %v59_v2 = vld [vmem:[#allocation5 + $0x30] sm:$0xff] }
  0x3b   :  { %430 = vmatpush1.msra.mxu0 %v153_v40  ;;  %501 = vmatpush1.msra.mxu1 %v155_v41  ;;  %v174_v3 = vld [vmem:[#allocation5 + $0x3c8] sm:$0xff]  ;;  %v176_v4 = vld [vmem:[#allocation5 + $0x3d8] sm:$0xff]  ;;  %v173_v5 = vld [vmem:[#allocation5 + $0x3c0] sm:$0xff] }
  0x3c   :  { %431 = vmatprep.subr.mxu0 %v138_v42  ;;  %502 = vmatprep.subr.mxu1 %v140_v43  ;;  %v175_v6 = vld [vmem:[#allocation5 + $0x3d0] sm:$0xff]  ;;  %v158_v7 = vld [vmem:[#allocation5 + $0x348] sm:$0xff]  ;;  %v160_v8 = vld [vmem:[#allocation5 + $0x358] sm:$0xff] }
  0x3d   :  { %432 = vmatpush1.msra.mxu0 %v137_v44  ;;  %503 = vmatpush1.msra.mxu1 %v139_v45  ;;  %v157_v9 = vld [vmem:[#allocation5 + $0x340] sm:$0xff]  ;;  %v159_v10 = vld [vmem:[#allocation5 + $0x350] sm:$0xff]  ;;  %v142_v11 = vld [vmem:[#allocation5 + $0x2c8] sm:$0xff] }
  0x3e   :  { %433 = vmatprep.subr.mxu0 %v122_v46  ;;  %504 = vmatprep.subr.mxu1 %v124_v47  ;;  %v144_v12 = vld [vmem:[#allocation5 + $0x2d8] sm:$0xff]  ;;  %v141_v13 = vld [vmem:[#allocation5 + $0x2c0] sm:$0xff]  ;;  %v143_v14 = vld [vmem:[#allocation5 + $0x2d0] sm:$0xff] }
  0x3f   :  { %434 = vmatpush1.msra.mxu0 %v121_v48  ;;  %505 = vmatpush1.msra.mxu1 %v123_v49  ;;  %v126_v15 = vld [vmem:[#allocation5 + $0x248] sm:$0xff]  ;;  %v128_v16 = vld [vmem:[#allocation5 + $0x258] sm:$0xff]  ;;  %v125_v17 = vld [vmem:[#allocation5 + $0x240] sm:$0xff] }
  0x40   :  { %435 = vmatprep.subr.mxu0 %v106_v50  ;;  %506 = vmatprep.subr.mxu1 %v108_v51  ;;  %v127_v18 = vld [vmem:[#allocation5 + $0x250] sm:$0xff]  ;;  %v110_v19 = vld [vmem:[#allocation5 + $0x1c8] sm:$0xff]  ;;  %v112_v20 = vld [vmem:[#allocation5 + $0x1d8] sm:$0xff] }
  0x41   :  { %436 = vmatpush1.msra.mxu0 %v105_v52  ;;  %507 = vmatpush1.msra.mxu1 %v107_v53  ;;  %v109_v21 = vld [vmem:[#allocation5 + $0x1c0] sm:$0xff]  ;;  %v111_v22 = vld [vmem:[#allocation5 + $0x1d0] sm:$0xff]  ;;  %v94_v23 = vld [vmem:[#allocation5 + $0x148] sm:$0xff] }
  0x42   :  { %437 = vmatprep.subr.mxu0 %v90_v54  ;;  %508 = vmatprep.subr.mxu1 %v92_v55  ;;  %v96_v24 = vld [vmem:[#allocation5 + $0x158] sm:$0xff]  ;;  %v93_v25 = vld [vmem:[#allocation5 + $0x140] sm:$0xff]  ;;  %v95_v26 = vld [vmem:[#allocation5 + $0x150] sm:$0xff] }
  0x43   :  { %438 = vmatpush1.msra.mxu0 %v89_v56  ;;  %509 = vmatpush1.msra.mxu1 %v91_v57  ;;  %v78_v27 = vld [vmem:[#allocation5 + $0xc8] sm:$0xff]  ;;  %v80_v28 = vld [vmem:[#allocation5 + $0xd8] sm:$0xff]  ;;  %v77_v29 = vld [vmem:[#allocation5 + $0xc0] sm:$0xff] }
  0x44   :  { %439 = vmatprep.subr.mxu0 %v74_v58  ;;  %510 = vmatprep.subr.mxu1 %v76_v59  ;;  %v79_v30 = vld [vmem:[#allocation5 + $0xd0] sm:$0xff]  ;;  %v62_v31 = vld [vmem:[#allocation5 + $0x48] sm:$0xff]  ;;  %v64_v32 = vld [vmem:[#allocation5 + $0x58] sm:$0xff] }
  0x45   :  { %440 = vmatpush1.msra.mxu0 %v73_v60  ;;  %511 = vmatpush1.msra.mxu1 %v75_v61  ;;  %v61_v34 = vld [vmem:[#allocation5 + $0x40] sm:$0xff]  ;;  %v63_v35 = vld [vmem:[#allocation5 + $0x50] sm:$0xff]  ;;  %v178_v36 = vld [vmem:[#allocation5 + $0x3e8] sm:$0xff] }
  0x46   :  { %441 = vmatprep.subr.mxu0 %v58_v62  ;;  %512 = vmatprep.subr.mxu1 %v60_v63  ;;  %v180_v37 = vld [vmem:[#allocation5 + $0x3f8] sm:$0xff]  ;;  %v177_v38 = vld [vmem:[#allocation5 + $0x3e0] sm:$0xff]  ;;  %v179_v39 = vld [vmem:[#allocation5 + $0x3f0] sm:$0xff] }
  0x47   :  { %442 = vmatpush1.msra.mxu0 %v57_v1  ;;  %475 = vmatprep.mubr.f32.mxu0 %v1052_v0  ;;  %v162_v40 = vld [vmem:[#allocation5 + $0x368] sm:$0xff]  ;;  %v164_v41 = vld [vmem:[#allocation5 + $0x378] sm:$0xff]  ;;  %v161_v42 = vld [vmem:[#allocation5 + $0x360] sm:$0xff] }
  0x48   :  { %513 = vmatpush1.msra.mxu1 %v59_v2  ;;  %546 = vmatprep.mubr.f32.mxu1 %v1052_v0  ;;  %v163_v43 = vld [vmem:[#allocation5 + $0x370] sm:$0xff]  ;;  %v146_v44 = vld [vmem:[#allocation5 + $0x2e8] sm:$0xff]  ;;  %v148_v45 = vld [vmem:[#allocation5 + $0x2f8] sm:$0xff] }
  0x49   :  { %947 = vmatmul.mubr.msk.f32.vlgmr.msra.gmra.mxu0 %vm265_vm0, %v1086_v33  ;;  %948 = vmatmul.mubr.msk.f32.vlgmr.msra.gmra.mxu1 %vm265_vm0, %v1086_v33  ;;  %v145_v46 = vld [vmem:[#allocation5 + $0x2e0] sm:$0xff]  ;;  %v147_v47 = vld [vmem:[#allocation5 + $0x2f0] sm:$0xff]  ;;  %v130_v48 = vld [vmem:[#allocation5 + $0x268] sm:$0xff] }
  0x4a   :  { %569 = vmatprep.subr.mxu0 %v174_v3  ;;  %640 = vmatprep.subr.mxu1 %v176_v4  ;;  %v132_v49 = vld [vmem:[#allocation5 + $0x278] sm:$0xff]  ;;  %v129_v50 = vld [vmem:[#allocation5 + $0x260] sm:$0xff]  ;;  %v131_v51 = vld [vmem:[#allocation5 + $0x270] sm:$0xff] }
  0x4b   :  { %570 = vmatpush1.msra.mxu0 %v173_v5  ;;  %641 = vmatpush1.msra.mxu1 %v175_v6  ;;  %v114_v52 = vld [vmem:[#allocation5 + $0x1e8] sm:$0xff]  ;;  %v116_v53 = vld [vmem:[#allocation5 + $0x1f8] sm:$0xff]  ;;  %v113_v54 = vld [vmem:[#allocation5 + $0x1e0] sm:$0xff]  ;;  %v185_v5 = vlaneseq }
  0x4c   :  { %571 = vmatprep.subr.mxu0 %v158_v7  ;;  %642 = vmatprep.subr.mxu1 %v160_v8  ;;  %v115_v55 = vld [vmem:[#allocation5 + $0x1f0] sm:$0xff]  ;;  %v98_v56 = vld [vmem:[#allocation5 + $0x168] sm:$0xff]  ;;  %v100_v57 = vld [vmem:[#allocation5 + $0x178] sm:$0xff] }
  0x4d   :  { %572 = vmatpush1.msra.mxu0 %v157_v9  ;;  %643 = vmatpush1.msra.mxu1 %v159_v10  ;;  %v97_v58 = vld [vmem:[#allocation5 + $0x160] sm:$0xff]  ;;  %v99_v59 = vld [vmem:[#allocation5 + $0x170] sm:$0xff]  ;;  %v82_v60 = vld [vmem:[#allocation5 + $0xe8] sm:$0xff]  ;;  %v1110_v6 = vshrl.u32 %v185_v5, 7 }
  0x4e   :  { %573 = vmatprep.subr.mxu0 %v142_v11  ;;  %644 = vmatprep.subr.mxu1 %v144_v12  ;;  %v84_v61 = vld [vmem:[#allocation5 + $0xf8] sm:$0xff]  ;;  %v81_v62 = vld [vmem:[#allocation5 + $0xe0] sm:$0xff]  ;;  %v83_v63 = vld [vmem:[#allocation5 + $0xf0] sm:$0xff]  ;;  %v1053_v11 = vmov 1983009808  }
  0x4f   :  { %574 = vmatpush1.msra.mxu0 %v141_v13  ;;  %645 = vmatpush1.msra.mxu1 %v143_v14  ;;  %v66_v1 = vld [vmem:[#allocation5 + $0x68] sm:$0xff]  ;;  %v68_v2 = vld [vmem:[#allocation5 + $0x78] sm:$0xff]  ;;  %v65_v3 = vld [vmem:[#allocation5 + $0x60] sm:$0xff]  ;;  %v187_v7 = vsub.s32 0, %v1110_v6  ;;  %v195_v8 = vsub.s32 2, %v1110_v6  ;;  %v191_v10 = vsub.s32 1, %v1110_v6  ;;  %v856_v12 = vunpack.c.l.s4 %v1053_v11 }
  0x50   :  { %575 = vmatprep.subr.mxu0 %v126_v15  ;;  %646 = vmatprep.subr.mxu1 %v128_v16  ;;  %v67_v4 = vld [vmem:[#allocation5 + $0x70] sm:$0xff]  ;;  %v181_v9 = vld [vmem:[#allocation7] sm:$0xff] }
  0x51   :  { %576 = vmatpush1.msra.mxu0 %v125_v17  ;;  %647 = vmatpush1.msra.mxu1 %v127_v18  ;;  %v188_v13 = vrot.slane %v181_v9, %v187_v7  ;;  %v196_v14 = vrot.slane %v181_v9, %v195_v8  ;;  %v192_v15 = vrot.slane %v181_v9, %v191_v10  ;;  %v857_v16 = vunpack.c.0.s8 %v856_v12 }
  0x52   :  { %577 = vmatprep.subr.mxu0 %v110_v19  ;;  %648 = vmatprep.subr.mxu1 %v112_v20 }
  0x53   :  { %578 = vmatpush1.msra.mxu0 %v109_v21  ;;  %649 = vmatpush1.msra.mxu1 %v111_v22 }
  0x54   :  { %579 = vmatprep.subr.mxu0 %v94_v23  ;;  %650 = vmatprep.subr.mxu1 %v96_v24  ;;  %v1117_v24 = vsub.s32 %v857_v16, %v1110_v6 }
  0x55   :  { %580 = vmatpush1.msra.mxu0 %v93_v25  ;;  %651 = vmatpush1.msra.mxu1 %v95_v26 }
  0x56   :  { %581 = vmatprep.subr.mxu0 %v78_v27  ;;  %652 = vmatprep.subr.mxu1 %v80_v28 }
  0x57   :  { %582 = vmatpush1.msra.mxu0 %v77_v29  ;;  %653 = vmatpush1.msra.mxu1 %v79_v30 }
  0x58   :  { %583 = vmatprep.subr.mxu0 %v62_v31  ;;  %654 = vmatprep.subr.mxu1 %v64_v32  ;;  %v203_v31 = vsub.s32 4, %v1110_v6  ;;  %v211_v32 = vsub.s32 6, %v1110_v6 }
  0x59   :  { %584 = vmatpush1.msra.mxu0 %v61_v34  ;;  %617 = vmatprep.mubr.f32.mxu0 %v1052_v0  ;;  %v207_v34 = vsub.s32 5, %v1110_v6 }
  0x5a   :  { %655 = vmatpush1.msra.mxu1 %v63_v35  ;;  %688 = vmatprep.mubr.f32.mxu1 %v1052_v0  ;;  %v215_v35 = vsub.s32 7, %v1110_v6 }
  0x5b   :  { %949 = vmatmul.mubr.msk.f32.vlgmr.msra.gmra.mxu0 %vm265_vm0, %v1086_v33  ;;  %950 = vmatmul.mubr.msk.f32.vlgmr.msra.gmra.mxu1 %vm265_vm0, %v1086_v33 }
  0x5c   :  { %711 = vmatprep.subr.mxu0 %v178_v36  ;;  %782 = vmatprep.subr.mxu1 %v180_v37  ;;  %v204_v36 = vrot.slane %v181_v9, %v203_v31  ;;  %v212_v37 = vrot.slane %v181_v9, %v211_v32 }
  0x5d   :  { %712 = vmatpush1.msra.mxu0 %v177_v38  ;;  %783 = vmatpush1.msra.mxu1 %v179_v39  ;;  %v208_v38 = vrot.slane %v181_v9, %v207_v34  ;;  %v216_v39 = vrot.slane %v181_v9, %v215_v35 }
  0x5e   :  { %713 = vmatprep.subr.mxu0 %v162_v40  ;;  %784 = vmatprep.subr.mxu1 %v164_v41 }
  0x5f   :  { %714 = vmatpush1.msra.mxu0 %v161_v42  ;;  %785 = vmatpush1.msra.mxu1 %v163_v43 }
  0x60   :  { %715 = vmatprep.subr.mxu0 %v146_v44  ;;  %786 = vmatprep.subr.mxu1 %v148_v45 }
  0x61   :  { %716 = vmatpush1.msra.mxu0 %v145_v46  ;;  %787 = vmatpush1.msra.mxu1 %v147_v47 }
  0x62   :  { %717 = vmatprep.subr.mxu0 %v130_v48  ;;  %788 = vmatprep.subr.mxu1 %v132_v49 }
  0x63   :  { %718 = vmatpush1.msra.mxu0 %v129_v50  ;;  %789 = vmatpush1.msra.mxu1 %v131_v51 }
  0x64   :  { %719 = vmatprep.subr.mxu0 %v114_v52  ;;  %790 = vmatprep.subr.mxu1 %v116_v53  ;;  %v182_v53 = vld [vmem:[#allocation7 + $0x8] sm:$0xff] }
  0x65   :  { %720 = vmatpush1.msra.mxu0 %v113_v54  ;;  %791 = vmatpush1.msra.mxu1 %v115_v55  ;;  %v220_v54 = vrot.slane %v182_v53, %v187_v7  ;;  %v228_v55 = vrot.slane %v182_v53, %v195_v8  ;;  %v236_v7 = vrot.slane %v182_v53, %v203_v31 }
  0x66   :  { %721 = vmatprep.subr.mxu0 %v98_v56  ;;  %792 = vmatprep.subr.mxu1 %v100_v57  ;;  %v224_v56 = vrot.slane %v182_v53, %v191_v10  ;;  %v244_v8 = vrot.slane %v182_v53, %v211_v32  ;;  %v240_v10 = vrot.slane %v182_v53, %v207_v34 }
  0x67   :  { %722 = vmatpush1.msra.mxu0 %v97_v58  ;;  %793 = vmatpush1.msra.mxu1 %v99_v59  ;;  %v248_v11 = vrot.slane %v182_v53, %v215_v35 }
  0x68   :  { %723 = vmatprep.subr.mxu0 %v82_v60  ;;  %794 = vmatprep.subr.mxu1 %v84_v61 }
  0x69   :  { %724 = vmatpush1.msra.mxu0 %v81_v62  ;;  %795 = vmatpush1.msra.mxu1 %v83_v63 }
  0x6a   :  { %725 = vmatprep.subr.mxu0 %v66_v1  ;;  %796 = vmatprep.subr.mxu1 %v68_v2 }
  0x6b   :  { %726 = vmatpush1.msra.mxu0 %v65_v3  ;;  %759 = vmatprep.mubr.f32.mxu0 %v1052_v0 }
  0x6c   :  { %797 = vmatpush1.msra.mxu1 %v67_v4  ;;  %830 = vmatprep.mubr.f32.mxu1 %v1052_v0  ;;  %v199_v0 = vsub.s32 3, %v1110_v6 }
  0x6d   :  { %951 = vmatmul.mubr.msk.f32.vlgmr.msra.gmra.mxu0 %vm265_vm0, %v1086_v33  ;;  %952 = vmatmul.mubr.msk.f32.vlgmr.msra.gmra.mxu1 %vm265_vm0, %v1086_v33 }
  0x6e   :  { %v200_v17 = vrot.slane %v181_v9, %v199_v0  ;;  %v232_v57 = vrot.slane %v182_v53, %v199_v0 }
  0xf7   :  { %v335_v33 = vpop.f32.mrf.mxu0  ;;  %v406_v18 = vpop.f32.mrf.mxu1 }
  0xf8   :  { %v336_v19 = vadd.f32 %v335_v33, %v188_v13  ;;  %v407_v20 = vadd.f32 %v406_v18, %v196_v14 }
  0xf9   :  { %v337_v21 = vpop.f32.mrf.mxu0  ;;  %v408_v22 = vpop.f32.mrf.mxu1 }
  0xfa   :  { %v338_v23 = vadd.f32 %v337_v21, %v192_v15  ;;  %v409_v25 = vadd.f32 %v408_v22, %v200_v17 }
  0xfc   :  { %v853_v26 = vcombine.low %v336_v19, %v338_v23  ;;  %v854_v27 = vcombine.low %v407_v20, %v409_v25 }
  0xfe   :  { %v861_v28 = vrot.slane %v853_v26, %v1117_v24  ;;  %v868_v29 = vrot.slane %v854_v27, %v1117_v24 }
 0x100   :  { %v869_v30 = vcombine.low %v861_v28, %v868_v29 }
 0x102   :  { %925 = vst [vmem:[#allocation8] sm:$0xff] %v869_v30 }
 0x109   :  { %v477_v40 = vpop.f32.mrf.mxu0  ;;  %v548_v41 = vpop.f32.mrf.mxu1 }
 0x10a   :  { %v478_v42 = vadd.f32 %v477_v40, %v204_v36  ;;  %v549_v43 = vadd.f32 %v548_v41, %v212_v37 }
 0x10b   :  { %v479_v44 = vpop.f32.mrf.mxu0  ;;  %v550_v45 = vpop.f32.mrf.mxu1 }
 0x10c   :  { %v480_v46 = vadd.f32 %v479_v44, %v208_v38  ;;  %v551_v47 = vadd.f32 %v550_v45, %v216_v39 }
 0x10e   :  { %v870_v48 = vcombine.low %v478_v42, %v480_v46  ;;  %v871_v49 = vcombine.low %v549_v43, %v551_v47 }
 0x110   :  { %v878_v50 = vrot.slane %v870_v48, %v1117_v24  ;;  %v885_v51 = vrot.slane %v871_v49, %v1117_v24 }
 0x112   :  { %v886_v52 = vcombine.low %v878_v50, %v885_v51 }
 0x114   :  { %926 = vst [vmem:[#allocation8 + $0x8] sm:$0xff] %v886_v52 }
 0x11b   :  { %v619_v58 = vpop.f32.mrf.mxu0  ;;  %v690_v59 = vpop.f32.mrf.mxu1 }
 0x11c   :  { %v620_v60 = vadd.f32 %v619_v58, %v220_v54  ;;  %v691_v61 = vadd.f32 %v690_v59, %v228_v55 }
 0x11d   :  { %v621_v62 = vpop.f32.mrf.mxu0  ;;  %v692_v63 = vpop.f32.mrf.mxu1 }
 0x11e   :  { %v622_v1 = vadd.f32 %v621_v62, %v224_v56  ;;  %v693_v2 = vadd.f32 %v692_v63, %v232_v57 }
 0x120   :  { %v887_v3 = vcombine.low %v620_v60, %v622_v1  ;;  %v888_v4 = vcombine.low %v691_v61, %v693_v2 }
 0x122   :  { %v895_v5 = vrot.slane %v887_v3, %v1117_v24  ;;  %v902_v6 = vrot.slane %v888_v4, %v1117_v24 }
 0x124   :  { %v903_v9 = vcombine.low %v895_v5, %v902_v6 }
 0x126   :  { %927 = vst [vmem:[#allocation8 + $0x10] sm:$0xff] %v903_v9 }
 0x12d   :  { %v761_v12 = vpop.f32.mrf.mxu0  ;;  %v832_v0 = vpop.f32.mrf.mxu1 }
 0x12e   :  { %v762_v15 = vadd.f32 %v761_v12, %v236_v7  ;;  %v833_v16 = vadd.f32 %v832_v0, %v244_v8 }
 0x12f   :  { %v763_v13 = vpop.f32.mrf.mxu0  ;;  %v834_v14 = vpop.f32.mrf.mxu1 }
 0x130   :  { %v764_v17 = vadd.f32 %v763_v13, %v240_v10  ;;  %v835_v33 = vadd.f32 %v834_v14, %v248_v11 }
 0x132   :  { %v904_v18 = vcombine.low %v762_v15, %v764_v17  ;;  %v905_v19 = vcombine.low %v833_v16, %v835_v33 }
 0x134   :  { %v912_v20 = vrot.slane %v904_v18, %v1117_v24  ;;  %v919_v21 = vrot.slane %v905_v19, %v1117_v24 }
 0x136   :  { %v920_v22 = vcombine.low %v912_v20, %v919_v21 }
 0x138   :  { %928 = vst [vmem:[#allocation8 + $0x18] sm:$0xff] %v920_v22 }
 0x139   :  { %1032 = shalt.err (!%p1029_p5)
}
 0x13a   :  { %938 = dma.vmem_to_hbm [thread:$0]  %s936_s2, 512, %s1137_s3, [#allocation4]  }
 0x13b   :  { %1045 = dma.done.wait [#allocation4], 512  }
 0x13c   :  { %1046 = vsyncadd [#allocation4], 4294966784 }
 0x13d   :  { %942 = vsyncpa [#allocation3], 1 }
 0x13e   :  { %943 = vsyncpa [#allocation6], 1 }
 0x13f   :  { %944 = vsyncpa [#allocation4], 1 }

</bundles_post_ra>
